<compile_context>
chip_gen: v5e
topology: v5e:2x2
jax: 0.10.0
libtpu: 0.0.40
codegen_flags: <defaults>
</compile_context>

<pallas_src>
import numpy as np
import jax
import jax.numpy as jnp
from jax.experimental import pallas as pl
from jax.experimental.pallas import tpu as pltpu


def _make_block_kernel(N, H, W, Cin, Cout, eps):
    NH = N * H
    WCin = W * Cin
    WCout = W * Cout
    inv_n = 1.0 / float(N * H * W)

    def kernel(x_ref, wb_ref, gb_ref, o_ref):
        # x_ref : (N*H, W*Cin)        whole batch, channels-last, W/Cin lane-flattened
        # wb_ref: (3, W*Cin, W*Cout)  banded conv weights, one slab per vertical tap
        # gb_ref: (2, W*Cout)         row 0: gamma lane-tiled, row 1: beta lane-tiled
        # o_ref : (N*H, W*Cout)       final Block output (lane-dense last dim)

        # ---- 3x3 'same' conv as three banded MXU matmuls ------------------------
        x = x_ref[...]                                    # (NH, WCin)
        # Vertical neighbours via XLU rolls along the stacked-batch row axis; the
        # wrapped rows are exactly the image-boundary rows and get masked to zero
        # (the vertical 'same' padding).  No halo scratch, no misaligned slices.
        up = pltpu.roll(x, shift=1, axis=0)               # row r -> x[r-1]
        dn = pltpu.roll(x, shift=NH - 1, axis=0)          # row r -> x[r+1]
        h = jax.lax.broadcasted_iota(jnp.int32, (NH, WCin), 0) % H
        zero = jnp.zeros_like(x)
        up = jnp.where(h == 0, zero, up)
        dn = jnp.where(h == H - 1, zero, dn)

        y = jnp.dot(up, wb_ref[0], preferred_element_type=jnp.float32)
        y = y + jnp.dot(x, wb_ref[1], preferred_element_type=jnp.float32)
        y = y + jnp.dot(dn, wb_ref[2], preferred_element_type=jnp.float32)  # (NH, WCout)

        # ---- training-mode BatchNorm statistics, fully in-kernel -----------------
        # Per-lane (column j, channel co) sums over all rows, then pool lanes of the
        # same channel with a tiny 0/1 matmul so mean/var stay lane-tiled.
        s = jnp.sum(y, axis=0, keepdims=True)             # (1, WCout)
        ss = jnp.sum(y * y, axis=0, keepdims=True)        # (1, WCout)
        sst = jnp.concatenate([s, ss], axis=0)            # (2, WCout)
        li = jax.lax.broadcasted_iota(jnp.int32, (WCout, WCout), 0)
        mi = jax.lax.broadcasted_iota(jnp.int32, (WCout, WCout), 1)
        pool = jnp.where((li % Cout) == (mi % Cout), 1.0, 0.0).astype(jnp.float32)
        pooled = jnp.dot(sst, pool, preferred_element_type=jnp.float32)   # (2, WCout)

        mean = pooled[0:1, :] * inv_n
        var = jnp.maximum(pooled[1:2, :] * inv_n - mean * mean, 0.0)      # biased var
        scale = gb_ref[0:1, :] * jax.lax.rsqrt(var + eps)
        shift = gb_ref[1:2, :] - mean * scale

        # ---- folded BN affine + LeakyReLU(0.01), lane-dense store ----------------
        v = y * scale + shift
        o_ref[...] = jnp.where(v >= 0, v, 0.01 * v)

    return kernel


def _banded_weights(conv_w_oihw, W):
    """(Cout, Cin, 3, 3) -> (3, W*Cin, W*Cout) block-Toeplitz-over-W weight slabs.

    Wb[dh, jp*Cin + ci, j*Cout + co] = w_hwio[dh, jp-j+1, ci, co] when |jp - j| <= 1,
    else 0, so the horizontal 'same' padding is encoded in the band.  The 0/1 band
    mask is a trace-time numpy constant, so per forward this is a single einsum.
    """
    Cout, Cin, _, _ = conv_w_oihw.shape
    band = np.zeros((3, W, W), np.float32)
    for dw in range(3):
        for j in range(W):
            jp = j + dw - 1
            if 0 <= jp < W:
                band[dw, jp, j] = 1.0
    w_hwio = jnp.transpose(conv_w_oihw, (2, 3, 1, 0)).astype(jnp.float32)  # (3,3,Cin,Cout)
    wb = jnp.einsum('dpj,hdio->hpijo', jnp.asarray(band), w_hwio)          # (3,W,Cin,W,Cout)
    return wb.reshape(3, W * Cin, W * Cout)


def block_forward(x_nchw, conv_w_oihw, conv_b, gamma, beta, eps=1e-5):
    """Forward of Block, fused into a single Pallas call over the whole batch."""
    N, Cin, H, W = x_nchw.shape
    Cout = conv_w_oihw.shape[0]
    NH, WCin, WCout = N * H, W * Cin, W * Cout
    del conv_b  # cancels exactly under training-mode BatchNorm (batch mean absorbs it)

    # NCHW -> channels-last, lane-flattened (N*H, W*Cin).
    # TODO(synk): keep NHWC end-to-end when the surrounding graph allows; entry/exit
    # transposes are kept only to preserve the module's NCHW contract.
    x2d = jnp.transpose(x_nchw, (0, 2, 3, 1)).astype(jnp.float32).reshape(NH, WCin)
    wb = _banded_weights(conv_w_oihw, W)
    gb = jnp.stack([jnp.tile(gamma.astype(jnp.float32), W),
                    jnp.tile(beta.astype(jnp.float32), W)])               # (2, WCout)

    out2d = pl.pallas_call(
        _make_block_kernel(N, H, W, Cin, Cout, float(eps)),
        out_shape=jax.ShapeDtypeStruct((NH, WCout), jnp.float32),
        in_specs=[
            pl.BlockSpec((NH, WCin), lambda: (0, 0)),
            pl.BlockSpec((3, WCin, WCout), lambda: (0, 0, 0)),
            pl.BlockSpec((2, WCout), lambda: (0, 0)),
        ],
        out_specs=pl.BlockSpec((NH, WCout), lambda: (0, 0)),
        compiler_params=pltpu.CompilerParams(vmem_limit_bytes=32 * 1024 * 1024),
    )(x2d, wb, gb)

    return jnp.transpose(out2d.reshape(N, H, W, Cout), (0, 3, 1, 2))


if __name__ == "__main__":
    key = jax.random.PRNGKey(0)
    N, Cin, Cout, H, W = 2, 4, 8, 16, 16
    k1, k2, k3 = jax.random.split(key, 3)

    x = jax.random.normal(k1, (N, Cin, H, W), jnp.float32)

    # Deterministic parameter init (shapes per nn.Conv2d / nn.BatchNorm2d defaults).
    fan_in = Cin * 3 * 3
    bound = 1.0 / (fan_in ** 0.5)
    conv_w = jax.random.uniform(k2, (Cout, Cin, 3, 3), jnp.float32, -bound, bound)
    conv_b = jax.random.uniform(k3, (Cout,), jnp.float32, -bound, bound)
    gamma = jnp.ones((Cout,), jnp.float32)
    beta = jnp.zeros((Cout,), jnp.float32)

    fwd = jax.jit(block_forward)
    out = jax.block_until_ready(fwd(x, conv_w, conv_b, gamma, beta))

    # Pure-JAX reference (conv + bias + training-mode BN + LeakyReLU) for verification.
    y_ref = jax.lax.conv_general_dilated(
        x, conv_w, window_strides=(1, 1), padding=((1, 1), (1, 1)),
        dimension_numbers=("NCHW", "OIHW", "NCHW"))
    y_ref = y_ref + conv_b.reshape(1, Cout, 1, 1)
    mean = jnp.mean(y_ref, axis=(0, 2, 3), keepdims=True)
    var = jnp.var(y_ref, axis=(0, 2, 3), keepdims=True)
    z = (y_ref - mean) / jnp.sqrt(var + 1e-5) * gamma.reshape(1, Cout, 1, 1) \
        + beta.reshape(1, Cout, 1, 1)
    ref = jnp.where(z >= 0, z, 0.01 * z)

    assert out.shape == (N, Cout, H, W)
    max_err = float(jnp.max(jnp.abs(out - ref)))
    assert jnp.allclose(out, ref, atol=2e-4, rtol=2e-4), max_err
    print("KERNEL_OK")
</pallas_src>

<mosaic_0001>
module attributes {stable_mosaic.version = 11 : i64} {
  func.func @kernel(%arg0: memref<32x64xf32, #tpu.memory_space<vmem>>, %arg1: memref<3x64x128xf32, #tpu.memory_space<vmem>>, %arg2: memref<2x128xf32, #tpu.memory_space<vmem>>, %arg3: memref<32x128xf32, #tpu.memory_space<vmem>>) attributes {dimension_semantics = [], scalar_prefetch = 0 : i64, scratch_operands = 0 : i64, tpu.core_type = #tpu.core_type<tc>} {
    %c0 = arith.constant 0 : index
    %c0_0 = arith.constant 0 : index
    %0 = vector.load %arg0[%c0, %c0_0] : memref<32x64xf32, #tpu.memory_space<vmem>>, vector<32x64xf32>
    %c1_i32 = arith.constant 1 : i32
    %1 = tpu.dynamic_rotate %0 by %c1_i32 dim 0 : vector<32x64xf32>, i32 -> vector<32x64xf32>
    %c31_i32 = arith.constant 31 : i32
    %2 = tpu.dynamic_rotate %0 by %c31_i32 dim 0 : vector<32x64xf32>, i32 -> vector<32x64xf32>
    %3 = tpu.iota {dimensions = array<i32: 0>} : vector<32x64xi32>
    %c16_i32 = arith.constant 16 : i32
    %c0_i32 = arith.constant 0 : i32
    %4 = arith.cmpi eq, %c16_i32, %c0_i32 : i32
    %c1_i32_1 = arith.constant 1 : i32
    %5 = arith.select %4, %c1_i32_1, %c16_i32 : i32
    %6 = vector.broadcast %5 : i32 to vector<32x64xi32>
    %7 = arith.remsi %3, %6 : vector<32x64xi32>
    %c0_i32_2 = arith.constant 0 : i32
    %8 = vector.broadcast %c0_i32_2 : i32 to vector<32x64xi32>
    %9 = arith.cmpi ne, %7, %8 : vector<32x64xi32>
    %c0_i32_3 = arith.constant 0 : i32
    %10 = vector.broadcast %c0_i32_3 : i32 to vector<32x64xi32>
    %11 = arith.cmpi slt, %7, %10 : vector<32x64xi32>
    %c0_i32_4 = arith.constant 0 : i32
    %12 = arith.cmpi slt, %5, %c0_i32_4 : i32
    %13 = vector.broadcast %12 : i1 to vector<32x64xi1>
    %14 = vector.broadcast %13 : vector<32x64xi1> to vector<32x64xi1>
    %15 = arith.xori %11, %14 : vector<32x64xi1>
    %16 = arith.andi %15, %9 : vector<32x64xi1>
    %17 = vector.broadcast %5 : i32 to vector<32x64xi32>
    %18 = arith.addi %7, %17 : vector<32x64xi32>
    %19 = arith.select %16, %18, %7 : vector<32x64xi1>, vector<32x64xi32>
    %cst = arith.constant 0.000000e+00 : f32
    %20 = vector.broadcast %cst : f32 to vector<32x64xf32>
    %c0_i32_5 = arith.constant 0 : i32
    %21 = vector.broadcast %c0_i32_5 : i32 to vector<32x64xi32>
    %22 = arith.cmpi eq, %19, %21 : vector<32x64xi32>
    %23 = arith.select %22, %20, %1 : vector<32x64xi1>, vector<32x64xf32>
    %c15_i32 = arith.constant 15 : i32
    %24 = vector.broadcast %c15_i32 : i32 to vector<32x64xi32>
    %25 = arith.cmpi eq, %19, %24 : vector<32x64xi32>
    %26 = arith.select %25, %20, %2 : vector<32x64xi1>, vector<32x64xf32>
    %c0_6 = arith.constant 0 : index
    %c0_7 = arith.constant 0 : index
    %c0_8 = arith.constant 0 : index
    %27 = vector.load %arg1[%c0_6, %c0_7, %c0_8] : memref<3x64x128xf32, #tpu.memory_space<vmem>>, vector<1x64x128xf32>
    %28 = vector.shape_cast %27 : vector<1x64x128xf32> to vector<64x128xf32>
    %cst_9 = arith.constant dense<0.000000e+00> : vector<32x128xf32>
    %29 = tpu.matmul %23, %28, %cst_9 {dimension_numbers = #tpu.dot_dimension_numbers<[1], [0], [0], [1], [0, 0, 1, 1], [], []>} : vector<32x64xf32>, vector<64x128xf32>, vector<32x128xf32> -> vector<32x128xf32>
    %c1 = arith.constant 1 : index
    %c0_10 = arith.constant 0 : index
    %c0_11 = arith.constant 0 : index
    %30 = vector.load %arg1[%c1, %c0_10, %c0_11] : memref<3x64x128xf32, #tpu.memory_space<vmem>>, vector<1x64x128xf32>
    %31 = vector.shape_cast %30 : vector<1x64x128xf32> to vector<64x128xf32>
    %cst_12 = arith.constant dense<0.000000e+00> : vector<32x128xf32>
    %32 = tpu.matmul %0, %31, %cst_12 {dimension_numbers = #tpu.dot_dimension_numbers<[1], [0], [0], [1], [0, 0, 1, 1], [], []>} : vector<32x64xf32>, vector<64x128xf32>, vector<32x128xf32> -> vector<32x128xf32>
    %33 = arith.addf %29, %32 : vector<32x128xf32>
    %c2 = arith.constant 2 : index
    %c0_13 = arith.constant 0 : index
    %c0_14 = arith.constant 0 : index
    %34 = vector.load %arg1[%c2, %c0_13, %c0_14] : memref<3x64x128xf32, #tpu.memory_space<vmem>>, vector<1x64x128xf32>
    %35 = vector.shape_cast %34 : vector<1x64x128xf32> to vector<64x128xf32>
    %cst_15 = arith.constant dense<0.000000e+00> : vector<32x128xf32>
    %36 = tpu.matmul %26, %35, %cst_15 {dimension_numbers = #tpu.dot_dimension_numbers<[1], [0], [0], [1], [0, 0, 1, 1], [], []>} : vector<32x64xf32>, vector<64x128xf32>, vector<32x128xf32> -> vector<32x128xf32>
    %37 = arith.addf %33, %36 : vector<32x128xf32>
    %cst_16 = arith.constant dense<0.000000e+00> : vector<128xf32>
    %38 = vector.multi_reduction <add>, %37, %cst_16 [0] : vector<32x128xf32> to vector<128xf32>
    %39 = vector.shape_cast %38 : vector<128xf32> to vector<1x128xf32>
    %40 = arith.mulf %37, %37 : vector<32x128xf32>
    %cst_17 = arith.constant dense<0.000000e+00> : vector<128xf32>
    %41 = vector.multi_reduction <add>, %40, %cst_17 [0] : vector<32x128xf32> to vector<128xf32>
    %42 = vector.shape_cast %41 : vector<128xf32> to vector<1x128xf32>
    %43 = tpu.concatenate %39, %42 in 0 : vector<1x128xf32>, vector<1x128xf32> -> vector<2x128xf32>
    %44 = tpu.iota {dimensions = array<i32: 0>} : vector<128x128xi32>
    %45 = tpu.iota {dimensions = array<i32: 1>} : vector<128x128xi32>
    %c8_i32 = arith.constant 8 : i32
    %c0_i32_18 = arith.constant 0 : i32
    %46 = arith.cmpi eq, %c8_i32, %c0_i32_18 : i32
    %c1_i32_19 = arith.constant 1 : i32
    %47 = arith.select %46, %c1_i32_19, %c8_i32 : i32
    %48 = vector.broadcast %47 : i32 to vector<128x128xi32>
    %49 = arith.remsi %44, %48 : vector<128x128xi32>
    %c0_i32_20 = arith.constant 0 : i32
    %50 = vector.broadcast %c0_i32_20 : i32 to vector<128x128xi32>
    %51 = arith.cmpi ne, %49, %50 : vector<128x128xi32>
    %c0_i32_21 = arith.constant 0 : i32
    %52 = vector.broadcast %c0_i32_21 : i32 to vector<128x128xi32>
    %53 = arith.cmpi slt, %49, %52 : vector<128x128xi32>
    %c0_i32_22 = arith.constant 0 : i32
    %54 = arith.cmpi slt, %47, %c0_i32_22 : i32
    %55 = vector.broadcast %54 : i1 to vector<128x128xi1>
    %56 = vector.broadcast %55 : vector<128x128xi1> to vector<128x128xi1>
    %57 = arith.xori %53, %56 : vector<128x128xi1>
    %58 = arith.andi %57, %51 : vector<128x128xi1>
    %59 = vector.broadcast %47 : i32 to vector<128x128xi32>
    %60 = arith.addi %49, %59 : vector<128x128xi32>
    %61 = arith.select %58, %60, %49 : vector<128x128xi1>, vector<128x128xi32>
    %c8_i32_23 = arith.constant 8 : i32
    %c0_i32_24 = arith.constant 0 : i32
    %62 = arith.cmpi eq, %c8_i32_23, %c0_i32_24 : i32
    %c1_i32_25 = arith.constant 1 : i32
    %63 = arith.select %62, %c1_i32_25, %c8_i32_23 : i32
    %64 = vector.broadcast %63 : i32 to vector<128x128xi32>
    %65 = arith.remsi %45, %64 : vector<128x128xi32>
    %c0_i32_26 = arith.constant 0 : i32
    %66 = vector.broadcast %c0_i32_26 : i32 to vector<128x128xi32>
    %67 = arith.cmpi ne, %65, %66 : vector<128x128xi32>
    %c0_i32_27 = arith.constant 0 : i32
    %68 = vector.broadcast %c0_i32_27 : i32 to vector<128x128xi32>
    %69 = arith.cmpi slt, %65, %68 : vector<128x128xi32>
    %c0_i32_28 = arith.constant 0 : i32
    %70 = arith.cmpi slt, %63, %c0_i32_28 : i32
    %71 = vector.broadcast %70 : i1 to vector<128x128xi1>
    %72 = vector.broadcast %71 : vector<128x128xi1> to vector<128x128xi1>
    %73 = arith.xori %69, %72 : vector<128x128xi1>
    %74 = arith.andi %73, %67 : vector<128x128xi1>
    %75 = vector.broadcast %63 : i32 to vector<128x128xi32>
    %76 = arith.addi %65, %75 : vector<128x128xi32>
    %77 = arith.select %74, %76, %65 : vector<128x128xi1>, vector<128x128xi32>
    %78 = arith.cmpi eq, %61, %77 : vector<128x128xi32>
    %cst_29 = arith.constant 1.000000e+00 : f32
    %cst_30 = arith.constant 0.000000e+00 : f32
    %79 = vector.broadcast %cst_29 : f32 to vector<128x128xf32>
    %80 = vector.broadcast %cst_30 : f32 to vector<128x128xf32>
    %81 = arith.select %78, %79, %80 : vector<128x128xi1>, vector<128x128xf32>
    %cst_31 = arith.constant dense<0.000000e+00> : vector<2x128xf32>
    %82 = tpu.matmul %43, %81, %cst_31 {dimension_numbers = #tpu.dot_dimension_numbers<[1], [0], [0], [1], [0, 0, 1, 1], [], []>} : vector<2x128xf32>, vector<128x128xf32>, vector<2x128xf32> -> vector<2x128xf32>
    %83 = vector.extract_strided_slice %82 {offsets = [0, 0], sizes = [1, 128], strides = [1, 1]} : vector<2x128xf32> to vector<1x128xf32>
    %cst_32 = arith.constant 0.001953125 : f32
    %84 = vector.broadcast %cst_32 : f32 to vector<1x128xf32>
    %85 = arith.mulf %83, %84 : vector<1x128xf32>
    %86 = vector.extract_strided_slice %82 {offsets = [1, 0], sizes = [1, 128], strides = [1, 1]} : vector<2x128xf32> to vector<1x128xf32>
    %cst_33 = arith.constant 0.001953125 : f32
    %87 = vector.broadcast %cst_33 : f32 to vector<1x128xf32>
    %88 = arith.mulf %86, %87 : vector<1x128xf32>
    %89 = arith.mulf %85, %85 : vector<1x128xf32>
    %90 = arith.subf %88, %89 : vector<1x128xf32>
    %cst_34 = arith.constant 0.000000e+00 : f32
    %91 = vector.broadcast %cst_34 : f32 to vector<1x128xf32>
    %92 = arith.maximumf %90, %91 : vector<1x128xf32>
    %c0_35 = arith.constant 0 : index
    %c0_36 = arith.constant 0 : index
    %93 = vector.load %arg2[%c0_35, %c0_36] : memref<2x128xf32, #tpu.memory_space<vmem>>, vector<1x128xf32>
    %cst_37 = arith.constant 9.99999974E-6 : f32
    %94 = vector.broadcast %cst_37 : f32 to vector<1x128xf32>
    %95 = arith.addf %92, %94 : vector<1x128xf32>
    %96 = math.rsqrt %95 : vector<1x128xf32>
    %97 = arith.mulf %93, %96 : vector<1x128xf32>
    %c1_38 = arith.constant 1 : index
    %c0_39 = arith.constant 0 : index
    %98 = vector.load %arg2[%c1_38, %c0_39] : memref<2x128xf32, #tpu.memory_space<vmem>>, vector<1x128xf32>
    %99 = arith.mulf %85, %97 : vector<1x128xf32>
    %100 = arith.subf %98, %99 : vector<1x128xf32>
    %101 = vector.broadcast %97 : vector<1x128xf32> to vector<32x128xf32>
    %102 = arith.mulf %37, %101 : vector<32x128xf32>
    %103 = vector.broadcast %100 : vector<1x128xf32> to vector<32x128xf32>
    %104 = arith.addf %102, %103 : vector<32x128xf32>
    %cst_40 = arith.constant 0.000000e+00 : f32
    %105 = vector.broadcast %cst_40 : f32 to vector<32x128xf32>
    %106 = arith.cmpf oge, %104, %105 : vector<32x128xf32>
    %cst_41 = arith.constant 0.00999999977 : f32
    %107 = vector.broadcast %cst_41 : f32 to vector<32x128xf32>
    %108 = arith.mulf %107, %104 : vector<32x128xf32>
    %109 = arith.select %106, %104, %108 : vector<32x128xi1>, vector<32x128xf32>
    %c0_42 = arith.constant 0 : index
    %c0_43 = arith.constant 0 : index
    %110 = vector.load %arg3[%c0_42, %c0_43] : memref<32x128xf32, #tpu.memory_space<vmem>>, vector<32x128xf32>
    tpu.vector_store %arg3[%c0_42, %c0_43], %109 {strides = array<i32>} : memref<32x128xf32, #tpu.memory_space<vmem>>, vector<32x128xf32>,
    return
  }
}

</mosaic_0001>

<bundles_post_ra>
// kernel: tile.13
= control target key start
LH: loop header
LB: loop body
LE: loop exit
PB: predicated region body
PF: predicated region fallthrough
CT: control target
= control target key end

     0   :  { %s28_s0 = inlined_call_operand.vmem [shape: f32[8], index: 0, kind: input, shape index: {}]   ;;  %s29_s1 = inlined_call_operand.vmem [shape: f32[16,8], index: 1, kind: output, shape index: {}]  }
   0x1   :  { %v4_v0 = vld [vmem:[%s28_s0] ss:$0 sm:$0xff] }
   0x2   :  { %5 = vst [vmem:[%s29_s1] sm:$0xff] %v4_v0 }
   0x3   :  { %8 = vst [vmem:[%s29_s1 + $0x8] sm:$0xff] %v4_v0 }

// kernel: tile.18
= control target key start
LH: loop header
LB: loop body
LE: loop exit
PB: predicated region body
PF: predicated region fallthrough
CT: control target
= control target key end

     0   :  { %s131_s10 = smov 120   ;;  %s132_s11 = smov 104   ;;  %vm3_vm0 = vcmask 64512   ;;  %vm9_vm1 = vcmask 1048512   ;;  %vm15_vm2 = vcmask 982912   ;;  %vm21_vm3 = vcmask 917312   ;;  %s207_s0 = inlined_call_operand.vmem [shape: f32[16,8], index: 0, kind: input, shape index: {}]   ;;  %s208_s1 = inlined_call_operand.vmem [shape: f32[1,128], index: 1, kind: output, shape index: {}]  }
   0x1   :  { %v101_v0 = vld [vmem:[%s207_s0 + $0xf] sm:$0x1]   ;;  %v103_v1 = vld [vmem:[%s207_s0 + $0xd] sm:$0x1]   ;;  %v105_v2 = vld [vmem:[%s207_s0 + $0xb] sm:$0x1]  }
   0x2   :  { %7 = vrot.lane.b32.xlu0 %v101_v0, %s131_s10  ;;  %19 = vrot.lane.b32.xlu1 %v103_v1, %s132_s11  ;;  %s133_s14 = smov 88   ;;  %v102_v3 = vld [vmem:[%s207_s0 + $0xe] sm:$0x1]   ;;  %v104_v4 = vld [vmem:[%s207_s0 + $0xc] sm:$0x1]   ;;  %s134_s19 = smov 112  }
   0x3   :  { %31 = vrot.lane.b32.xlu2 %v105_v2, %s133_s14  ;;  %s135_s20 = smov 96   ;;  %v106_v5 = vld [vmem:[%s207_s0 + $0xa] sm:$0x1]   ;;  %s136_s23 = smov 80   ;;  %v107_v6 = vld [vmem:[%s207_s0 + $0x9] sm:$0x1]  }
   0x4   :  { %v108_v7 = vld [vmem:[%s207_s0 + $0x8] sm:$0x1]   ;;  %s137_s28 = smov 72   ;;  %s138_s29 = smov 64   ;;  %v109_v8 = vld [vmem:[%s207_s0 + $0x7] sm:$0x1]  }
   0x5   :  { %s139_s3 = smov 56   ;;  %v110_v9 = vld [vmem:[%s207_s0 + $0x6] sm:$0x1]   ;;  %v111_v10 = vld [vmem:[%s207_s0 + $0x5] sm:$0x1]   ;;  %s140_s8 = smov 48  }
   0x6   :  { %s141_s9 = smov 40   ;;  %v112_v11 = vld [vmem:[%s207_s0 + $0x4] sm:$0x1]   ;;  %s142_s12 = smov 32   ;;  %v113_v12 = vld [vmem:[%s207_s0 + $0x3] sm:$0x1]  }
   0x7   :  { %v114_v13 = vld [vmem:[%s207_s0 + $0x2] sm:$0x1]   ;;  %s143_s17 = smov 24   ;;  %s144_s18 = smov 16   ;;  %v115_v14 = vld [vmem:[%s207_s0 + $0x1] sm:$0x1]  }
   0x8   :  { %s145_s21 = smov 8   ;;  %v2_v15 = vld [vmem:[%s207_s0] sm:$0x1]   ;;  %vm27_vm4 = vcmask 851712   ;;  %vm33_vm5 = vcmask 786112   ;;  %vm39_vm6 = vcmask 720512  }
   0x9   :  { %4 = vst.msk [vmem:[#allocation0] sm:$0x1] %vm3_vm0, %v2_v15   ;;  %vm45_vm7 = vcmask 654912   ;;  %vm51_vm8 = vcmask 589312   ;;  %vm57_vm9 = vcmask 523712   ;;  %vm63_vm10 = vcmask 458112  }
   0xa   :  { %13 = vrot.lane.b32.xlu0 %v102_v3, %s134_s19  ;;  %25 = vrot.lane.b32.xlu1 %v104_v4, %s135_s20  ;;  %vm69_vm11 = vcmask 392512   ;;  %vm75_vm12 = vcmask 326912   ;;  %vm81_vm13 = vcmask 261312   ;;  %vm87_vm14 = vcmask 195712  }
   0xb   :  { %37 = vrot.lane.b32.xlu2 %v106_v5, %s136_s23  ;;  %vm93_vm15 = vcmask 130112  }
  0x12   :  { %43 = vrot.lane.b32.xlu0 %v107_v6, %s137_s28  ;;  %49 = vrot.lane.b32.xlu1 %v108_v7, %s138_s29 }
  0x13   :  { %55 = vrot.lane.b32.xlu2 %v109_v8, %s139_s3 }
  0x1a   :  { %61 = vrot.lane.b32.xlu0 %v110_v9, %s140_s8  ;;  %67 = vrot.lane.b32.xlu1 %v111_v10, %s141_s9 }
  0x1b   :  { %73 = vrot.lane.b32.xlu2 %v112_v11, %s142_s12 }
  0x22   :  { %79 = vrot.lane.b32.xlu0 %v113_v12, %s143_s17  ;;  %85 = vrot.lane.b32.xlu1 %v114_v13, %s144_s18 }
  0x23   :  { %91 = vrot.lane.b32.xlu2 %v115_v14, %s145_s21 }
  0x5d   :  { %v32_v16 = vpop.permute.xlu2 %31  }
  0x65   :  { %v38_v17 = vpop.permute.xlu2 %37  }
  0x6d   :  { %v56_v18 = vpop.permute.xlu2 %55  }
  0x74   :  { %v8_v19 = vpop.permute.xlu0 %7   ;;  %v20_v20 = vpop.permute.xlu1 %19  }
  0x75   :  { %10 = vst.msk [vmem:[#allocation0] sm:$0x1] %vm9_vm1, %v8_v19   ;;  %v74_v21 = vpop.permute.xlu2 %73  }
  0x7c   :  { %v14_v22 = vpop.permute.xlu0 %13   ;;  %v26_v23 = vpop.permute.xlu1 %25  }
  0x7d   :  { %16 = vst.msk [vmem:[#allocation0] sm:$0x1] %vm15_vm2, %v14_v22   ;;  %v92_v24 = vpop.permute.xlu2 %91  }
  0x7e   :  { %22 = vst.msk [vmem:[#allocation0] sm:$0x1] %vm21_vm3, %v20_v20  }
  0x7f   :  { %28 = vst.msk [vmem:[#allocation0] sm:$0x1] %vm27_vm4, %v26_v23  }
  0x80   :  { %34 = vst.msk [vmem:[#allocation0] sm:$0x1] %vm33_vm5, %v32_v16  }
  0x81   :  { %40 = vst.msk [vmem:[#allocation0] sm:$0x1] %vm39_vm6, %v38_v17  }
  0x84   :  { %v44_v25 = vpop.permute.xlu0 %43   ;;  %v50_v26 = vpop.permute.xlu1 %49  }
  0x85   :  { %46 = vst.msk [vmem:[#allocation0] sm:$0x1] %vm45_vm7, %v44_v25  }
  0x86   :  { %52 = vst.msk [vmem:[#allocation0] sm:$0x1] %vm51_vm8, %v50_v26  }
  0x87   :  { %58 = vst.msk [vmem:[#allocation0] sm:$0x1] %vm57_vm9, %v56_v18  }
  0x8c   :  { %v62_v27 = vpop.permute.xlu0 %61   ;;  %v68_v28 = vpop.permute.xlu1 %67  }
  0x8d   :  { %64 = vst.msk [vmem:[#allocation0] sm:$0x1] %vm63_vm10, %v62_v27  }
  0x8e   :  { %70 = vst.msk [vmem:[#allocation0] sm:$0x1] %vm69_vm11, %v68_v28  }
  0x8f   :  { %76 = vst.msk [vmem:[#allocation0] sm:$0x1] %vm75_vm12, %v74_v21  }
  0x94   :  { %v80_v29 = vpop.permute.xlu0 %79   ;;  %v86_v30 = vpop.permute.xlu1 %85  }
  0x95   :  { %82 = vst.msk [vmem:[#allocation0] sm:$0x1] %vm81_vm13, %v80_v29  }
  0x96   :  { %88 = vst.msk [vmem:[#allocation0] sm:$0x1] %vm87_vm14, %v86_v30  }
  0x97   :  { %94 = vst.msk [vmem:[#allocation0] sm:$0x1] %vm93_vm15, %v92_v24  }
  0x9e   :  { %v97_v31 = vld [vmem:[#allocation0] sm:$0x1] }
  0x9f   :  { %100 = vst [vmem:[%s208_s1] sm:$0x1] %v97_v31 }

// kernel: block_forward.1
= control target key start
LH: loop header
LB: loop body
LE: loop exit
PB: predicated region body
PF: predicated region fallthrough
CT: control target
= control target key end

     0   :  { %v22_v5 = vlaneseq  ;;  %vm122_vm3 = vcmask 523264   ;;  %s876_s1 = inlined_call_operand.vmem [shape: f32[3,64,128], index: 1, kind: input, shape index: {}]   ;;  %s877_s0 = inlined_call_operand.vmem [shape: f32[32,64], index: 0, kind: input, shape index: {}]   ;;  %s878_s2 = inlined_call_operand.vmem [shape: f32[2,128], index: 2, kind: input, shape index: {}]   ;;  %s879_s3 = inlined_call_operand.vmem [shape: f32[32,128], index: 3, kind: output, shape index: {}]  }
   0x1   :  { %v632_v0 = vld [vmem:[%s876_s1 + $0xb8] sm:$0xff]  ;;  %v631_v1 = vld [vmem:[%s876_s1 + $0xb0] sm:$0xff]  ;;  %v630_v6 = vld [vmem:[%s876_s1 + $0xa8] sm:$0xff] }
   0x2   :  { %v616_v2 = vld [vmem:[%s876_s1 + $0x78] sm:$0xff]  ;;  %234 = vmatpush.msra.mxu2 %v632_v0  ;;  %v615_v4 = vld [vmem:[%s876_s1 + $0x70] sm:$0xff]  ;;  %v614_v8 = vld [vmem:[%s876_s1 + $0x68] sm:$0xff]  ;;  %v714_v13 = vshrl.u32 %v22_v5, 7  ;;  %v296_v59 = vand.u32 127, %v22_v5 }
   0x3   :  { %143 = vmatpush.msra.mxu0 %v616_v2  ;;  %v112_v3 = vld [vmem:[%s876_s1 + $0x38] sm:$0xff]  ;;  %v111_v7 = vld [vmem:[%s876_s1 + $0x30] sm:$0xff]  ;;  %v110_v9 = vld [vmem:[%s876_s1 + $0x28] sm:$0xff] }
   0x4   :  { %184 = vmatpush.msra.mxu1 %v112_v3  ;;  %235 = vmatpush.msra.mxu2 %v631_v1  ;;  %v629_v10 = vld [vmem:[%s876_s1 + $0xa0] sm:$0xff]  ;;  %v628_v14 = vld [vmem:[%s876_s1 + $0x98] sm:$0xff]  ;;  %v15_v18 = vld [vmem:[%s877_s0 + $0x8] sm:$0xff]  ;;  %v45_v20 = vand.u32 15, %v714_v13  ;;  %vm24_vm0 = vcmp.lt.s32.totalorder %v714_v13, 1  ;;  %vm33_vm1 = vcmp.lt.s32.totalorder %v714_v13, 7 }
   0x5   :  { %144 = vmatpush.msra.mxu0 %v615_v4  ;;  %v613_v11 = vld [vmem:[%s876_s1 + $0x60] sm:$0xff]  ;;  %v612_v15 = vld [vmem:[%s876_s1 + $0x58] sm:$0xff]  ;;  %v627_v21 = vld [vmem:[%s876_s1 + $0x90] sm:$0xff]  ;;  %v30_v26 = vrot.slane %v15_v18, 1  ;;  %v760_v30 = vadd.s32 8, %v714_v13  ;;  %v19_v43 = vrot.slane %v15_v18, 7 }
   0x6   :  { %185 = vmatpush.msra.mxu1 %v111_v7  ;;  %236 = vmatpush.msra.mxu2 %v630_v6  ;;  %v109_v12 = vld [vmem:[%s876_s1 + $0x20] sm:$0xff]  ;;  %v108_v17 = vld [vmem:[%s876_s1 + $0x18] sm:$0xff]  ;;  %v611_v22 = vld [vmem:[%s876_s1 + $0x50] sm:$0xff]  ;;  %vm767_vm2 = vcmp.eq.s32.totalorder %v45_v20, 0  ;;  %v795_v44 = vadd.s32 16, %v714_v13  ;;  %v805_v50 = vadd.s32 24, %v714_v13 }
   0x7   :  { %145 = vmatpush.msra.mxu0 %v614_v8  ;;  %v725_v16 = vld [vmem:[%s877_s0] sm:$0xff]  ;;  %v744_v23 = vld [vmem:[%s877_s0 + $0x18] sm:$0xff]  ;;  %v107_v24 = vld [vmem:[%s876_s1 + $0x10] sm:$0xff]  ;;  %v52_v41 = vand.u32 15, %v760_v30  ;;  %v294_v58 = vadd.s32 120, %v714_v13  ;;  %v825_v61 = vand.u32 7, %v296_v59 }
   0x8   :  { %186 = vmatpush.msra.mxu1 %v110_v9  ;;  %237 = vmatpush.msra.mxu2 %v629_v10  ;;  %v18_v19 = vrot.slane %v725_v16, 7  ;;  %v29_v25 = vrot.slane %v725_v16, 1  ;;  %v21_v27 = vrot.slane %v744_v23, 7  ;;  %v626_v28 = vld [vmem:[%s876_s1 + $0x88] sm:$0xff]  ;;  %v16_v34 = vld [vmem:[%s877_s0 + $0x10] sm:$0xff]  ;;  %v625_v35 = vld [vmem:[%s876_s1 + $0x80] sm:$0xff] }
   0x9   :  { %146 = vmatpush.msra.mxu0 %v613_v11  ;;  %v610_v29 = vld [vmem:[%s876_s1 + $0x48] sm:$0xff]  ;;  %v609_v36 = vld [vmem:[%s876_s1 + $0x40] sm:$0xff]  ;;  %v31_v40 = vrot.slane %v16_v34, 1  ;;  %vm98_vm4 = vcmp.eq.s32.totalorder %v52_v41, 15  ;;  %v20_v47 = vrot.slane %v16_v34, 7  ;;  %v59_v48 = vand.u32 15, %v795_v44 }
   0xa   :  { %187 = vmatpush.msra.mxu1 %v109_v12  ;;  %238 = vmatpush.msra.mxu2 %v628_v14  ;;  %v106_v31 = vld [vmem:[%s876_s1 + $0x8] sm:$0xff]  ;;  %v28_v32 = vsel %vm24_vm0, %v21_v27, %v18_v19  ;;  %v36_v37 = vsel %vm33_vm1, %v29_v25, %v30_v26  ;;  %v105_v38 = vld [vmem:[%s876_s1] sm:$0xff]  ;;  %v27_v46 = vsel %vm24_vm0, %v18_v19, %v19_v43  ;;  %v32_v49 = vrot.slane %v744_v23, 1 }
   0xb   :  { %147 = vmatpush.msra.mxu0 %v612_v15  ;;  %v93_v39 = vsel %vm767_vm2, 0.0, %v28_v32  ;;  %v35_v42 = vsel %vm33_vm1, %v30_v26, %v31_v40  ;;  %v26_v51 = vsel %vm24_vm0, %v19_v43, %v20_v47  ;;  %vm91_vm5 = vcmp.eq.s32.totalorder %v59_v48, 0 }
   0xc   :  { %188 = vmatpush.msra.mxu1 %v108_v17  ;;  %239 = vmatpush.msra.mxu2 %v627_v21  ;;  %v102_v45 = vsel %vm98_vm4, 0.0, %v35_v42  ;;  %v34_v52 = vsel %vm33_vm1, %v31_v40, %v32_v49  ;;  %v95_v53 = vsel %vm91_vm5, 0.0, %v26_v51  ;;  %v66_v54 = vand.u32 15, %v805_v50 }
   0xd   :  { %148 = vmatpush.msra.mxu0 %v611_v22  ;;  %v37_v55 = vsel %vm33_vm1, %v32_v49, %v29_v25  ;;  %v25_v57 = vsel %vm24_vm0, %v20_v47, %v21_v27  ;;  %v406_v60 = vand.u32 7, %v294_v58  ;;  %v293_v62 = vadd.s32 112, %v714_v13 }
   0xe   :  { %189 = vmatpush.msra.mxu1 %v107_v24  ;;  %240 = vmatpush.msra.mxu2 %v626_v28  ;;  %vm100_vm6 = vcmp.eq.s32.totalorder %v66_v54, 15  ;;  %v292_v0 = vadd.s32 104, %v714_v13  ;;  %v656_v1 = vmov 1.0   ;;  %v291_v3 = vadd.s32 96, %v714_v13 }
   0xf   :  { %149 = vmatpush.msra.mxu0 %v610_v29  ;;  %v104_v56 = vsel %vm100_vm6, 0.0, %v37_v55  ;;  %vm516_vm7 = vcmp.eq.s32.totalorder %v406_v60, %v825_v61  ;;  %v399_v63 = vand.u32 7, %v293_v62  ;;  %v290_v5 = vadd.s32 88, %v714_v13 }
  0x10   :  { %190 = vmatpush.msra.mxu1 %v106_v31  ;;  %241 = vmatpush.msra.mxu2 %v625_v35  ;;  %v392_v2 = vand.u32 7, %v292_v0  ;;  %v385_v4 = vand.u32 7, %v291_v3  ;;  %v289_v7 = vadd.s32 80, %v714_v13  ;;  %v288_v9 = vadd.s32 72, %v714_v13 }
  0x11   :  { %150 = vmatpush.msra.mxu0 %v609_v36  ;;  %633 = vmatmul.msk.f32.vlgmr.msra.gmra.mxu2 %vm122_vm3, %v36_v37  ;;  %vm515_vm8 = vcmp.eq.s32.totalorder %v399_v63, %v825_v61  ;;  %v378_v6 = vand.u32 7, %v290_v5  ;;  %v287_v11 = vadd.s32 64, %v714_v13  ;;  %v286_v14 = vadd.s32 56, %v714_v13 }
  0x12   :  { %191 = vmatpush.msra.mxu1 %v105_v38  ;;  %617 = vmatmul.msk.f32.vlgmr.msra.gmra.mxu0 %vm122_vm3, %v725_v16  ;;  %vm514_vm9 = vcmp.eq.s32.totalorder %v392_v2, %v825_v61  ;;  %vm513_vm10 = vcmp.eq.s32.totalorder %v385_v4, %v825_v61  ;;  %v371_v8 = vand.u32 7, %v289_v7  ;;  %v364_v10 = vand.u32 7, %v288_v9 }
  0x13   :  { %621 = vmatmul.msk.f32.vlgmr.msra.gmra.mxu1 %vm122_vm3, %v93_v39  ;;  %637 = vmatpush.msk.msra.mxu3 %vm516_vm7, %v656_v1  ;;  %vm512_vm11 = vcmp.eq.s32.totalorder %v378_v6, %v825_v61  ;;  %v357_v12 = vand.u32 7, %v287_v11  ;;  %v350_v15 = vand.u32 7, %v286_v14  ;;  %v285_v16 = vadd.s32 48, %v714_v13 }
  0x14   :  { %vm511_vm12 = vcmp.eq.s32.totalorder %v371_v8, %v825_v61  ;;  %vm510_vm13 = vcmp.eq.s32.totalorder %v364_v10, %v825_v61  ;;  %v284_v20 = vadd.s32 40, %v714_v13  ;;  %v283_v22 = vadd.s32 32, %v714_v13 }
  0x15   :  { %638 = vmatpush.msk.msra.mxu3 %vm515_vm8, %v656_v1  ;;  %vm509_vm14 = vcmp.eq.s32.totalorder %v357_v12, %v825_v61  ;;  %vm508_vm15 = vcmp.eq.s32.totalorder %v350_v15, %v825_v61  ;;  %v343_v19 = vand.u32 7, %v285_v16  ;;  %v315_v26 = vand.u32 7, %v795_v44 }
  0x16   :  { %v336_v21 = vand.u32 7, %v284_v20  ;;  %v329_v25 = vand.u32 7, %v283_v22  ;;  %v308_v27 = vand.u32 7, %v760_v30  ;;  %v301_v31 = vand.u32 7, %v714_v13  ;;  %v576_v22 = vld [vmem:[%s878_s2 + $0x1] sm:$0x1] }
  0x17   :  { %639 = vmatpush.msk.msra.mxu3 %vm514_vm9, %v656_v1  ;;  %vm507_vm0 = vcmp.eq.s32.totalorder %v343_v19, %v825_v61  ;;  %vm503_vm4 = vcmp.eq.s32.totalorder %v315_v26, %v825_v61  ;;  %vm281_vm7 = vcmask 1040384  }
  0x18   :  { %vm506_vm1 = vcmp.eq.s32.totalorder %v336_v21, %v825_v61  ;;  %vm505_vm2 = vcmp.eq.s32.totalorder %v329_v25, %v825_v61  ;;  %vm502_vm5 = vcmp.eq.s32.totalorder %v308_v27, %v825_v61  ;;  %vm501_vm6 = vcmp.eq.s32.totalorder %v301_v31, %v825_v61 }
  0x19   :  { %634 = vmatmul.msk.f32.gmra.mxu2 %vm122_vm3, %v102_v45  ;;  %640 = vmatpush.msk.msra.mxu3 %vm513_vm10, %v656_v1 }
  0x1a   :  { %618 = vmatmul.msk.f32.gmra.mxu0 %vm122_vm3, %v15_v18 }
  0x1b   :  { %622 = vmatmul.msk.f32.gmra.mxu1 %vm122_vm3, %v27_v46  ;;  %641 = vmatpush.msk.msra.mxu3 %vm512_vm11, %v656_v1 }
  0x1d   :  { %642 = vmatpush.msk.msra.mxu3 %vm511_vm12, %v656_v1 }
  0x1f   :  { %643 = vmatpush.msk.msra.mxu3 %vm510_vm13, %v656_v1 }
  0x21   :  { %635 = vmatmul.msk.f32.gmra.mxu2 %vm122_vm3, %v34_v52  ;;  %644 = vmatpush.msk.msra.mxu3 %vm509_vm14, %v656_v1 }
  0x22   :  { %619 = vmatmul.msk.f32.gmra.mxu0 %vm122_vm3, %v16_v34 }
  0x23   :  { %623 = vmatmul.msk.f32.gmra.mxu1 %vm122_vm3, %v95_v53  ;;  %645 = vmatpush.msk.msra.mxu3 %vm508_vm15, %v656_v1 }
  0x25   :  { %646 = vmatpush.msk.msra.mxu3 %vm507_vm0, %v656_v1 }
  0x27   :  { %647 = vmatpush.msk.msra.mxu3 %vm506_vm1, %v656_v1 }
  0x29   :  { %636 = vmatmul.msk.f32.gmra.mxu2 %vm122_vm3, %v104_v56  ;;  %648 = vmatpush.msk.msra.mxu3 %vm505_vm2, %v656_v1 }
  0x2a   :  { %620 = vmatmul.msk.f32.gmra.mxu0 %vm122_vm3, %v744_v23  ;;  %v322_v23 = vand.u32 7, %v805_v50 }
  0x2b   :  { %624 = vmatmul.msk.f32.gmra.mxu1 %vm122_vm3, %v25_v57 }
  0x2c   :  { %vm504_vm3 = vcmp.eq.s32.totalorder %v322_v23, %v825_v61 }
  0x2d   :  { %649 = vmatpush.msk.msra.mxu3 %vm504_vm3, %v656_v1 }
  0x2f   :  { %650 = vmatpush.msk.msra.mxu3 %vm503_vm4, %v656_v1 }
  0x31   :  { %651 = vmatpush.msk.msra.mxu3 %vm502_vm5, %v656_v1 }
  0x33   :  { %652 = vmatpush.msk.msra.mxu3 %vm501_vm6, %v656_v1 }
  0x8f   :  { %v152_v17 = vpop.f32.mrf.mxu0 }
  0x90   :  { %v193_v18 = vpop.f32.mrf.mxu1 }
  0x91   :  { %v194_v30 = vadd.f32 %v193_v18, %v152_v17  ;;  %v560_v18 = vld [vmem:[%s878_s2] sm:$0x1] }
  0x94   :  { %v243_v24 = vpop.f32.mrf.mxu2 }
  0x95   :  { %v255_v39 = vadd.f32 %v243_v24, %v194_v30 }
  0x97   :  { %v155_v28 = vpop.f32.mrf.mxu0  ;;  %v268_v44 = vmul.f32 %v255_v39, %v255_v39 }
  0x98   :  { %v196_v29 = vpop.f32.mrf.mxu1 }
  0x99   :  { %v197_v35 = vadd.f32 %v196_v29, %v155_v28 }
  0x9c   :  { %v246_v32 = vpop.f32.mrf.mxu2 }
  0x9d   :  { %v256_v38 = vadd.f32 %v246_v32, %v197_v35 }
  0x9f   :  { %v158_v33 = vpop.f32.mrf.mxu0  ;;  %v269_v42 = vmul.f32 %v256_v38, %v256_v38  ;;  %v259_v45 = vadd.f32 %v256_v38, %v255_v39 }
  0xa0   :  { %v199_v34 = vpop.f32.mrf.mxu1 }
  0xa1   :  { %v200_v36 = vadd.f32 %v199_v34, %v158_v33  ;;  %v272_v48 = vadd.f32 %v269_v42, %v268_v44 }
  0xa4   :  { %v249_v37 = vpop.f32.mrf.mxu2 }
  0xa5   :  { %v257_v40 = vadd.f32 %v249_v37, %v200_v36 }
  0xa7   :  { %v161_v41 = vpop.f32.mrf.mxu0  ;;  %v270_v46 = vmul.f32 %v257_v40, %v257_v40  ;;  %v260_v49 = vadd.f32 %v259_v45, %v257_v40 }
  0xa8   :  { %v202_v13 = vpop.f32.mrf.mxu1 }
  0xa9   :  { %v203_v43 = vadd.f32 %v202_v13, %v161_v41  ;;  %v273_v51 = vadd.f32 %v272_v48, %v270_v46 }
  0xac   :  { %v252_v47 = vpop.f32.mrf.mxu2 }
  0xad   :  { %v258_v50 = vadd.f32 %v252_v47, %v203_v43 }
  0xaf   :  { %v261_v52 = vadd.f32 %v260_v49, %v258_v50  ;;  %v271_v53 = vmul.f32 %v258_v50, %v258_v50 }
  0xb1   :  { %v262_v54 = vrot.slane %v261_v52, 4  ;;  %v274_v55 = vadd.f32 %v273_v51, %v271_v53 }
  0xb3   :  { %v263_v56 = vadd.f32 %v262_v54, %v261_v52  ;;  %v275_v57 = vrot.slane %v274_v55, 4 }
  0xb5   :  { %v264_v58 = vrot.slane %v263_v56, 2  ;;  %v276_v59 = vadd.f32 %v275_v57, %v274_v55 }
  0xb7   :  { %v265_v60 = vadd.f32 %v264_v58, %v263_v56  ;;  %v277_v61 = vrot.slane %v276_v59, 2 }
  0xb9   :  { %v266_v62 = vrot.slane %v265_v60, 1  ;;  %v278_v63 = vadd.f32 %v277_v61, %v276_v59 }
  0xbb   :  { %v279_v0 = vrot.slane %v278_v63, 1  ;;  %v267_v1 = vadd.f32 %v266_v62, %v265_v60 }
  0xbd   :  { %v280_v2 = vadd.f32 %v279_v0, %v278_v63 }
  0xbf   :  { %v282_v3 = vsel %vm281_vm7, %v267_v1, %v280_v2 }
  0xc0   :  { %549 = vmatmul.f32.vlgmr.msra.gmra.mxu3 %v282_v3 }
 0x143   :  { %v550_v4 = vpop.f32.mrf.mxu3 }
 0x144   :  { %v553_v5 = vmul.f32 0.001953125, %v550_v4 }
 0x146   :  { %v554_v6 = vmul.f32 %v553_v5, %v553_v5 }
 0x148   :  { %v556_v7 = vrot.slane %v554_v6, 7 }
 0x14a   :  { %v558_v8 = vsub.f32 %v553_v5, %v556_v7 }
 0x14c   :  { %v559_v9 = vmax.f32 %v558_v8, 0.0 }
 0x14e   :  { %v561_v10 = vadd.f32 1e-05, %v559_v9 }
 0x150   :  { %654 = vrsqrt.f32 %v561_v10  ;;  %vm568_vm9 = vweird.f32 %v561_v10 }
 0x156   :  { %v655_v11 = vpop.eup %654 }
 0x157   :  { %v563_v12 = vmul.f32 %v655_v11, %v561_v10  ;;  %vm569_vm8 = vweird.f32 %v655_v11 }
 0x158   :  { %vm570_vm10 = vmor %vm568_vm9, %vm569_vm8 }
 0x159   :  { %v564_v14 = vmul.f32 %v655_v11, %v563_v12 }
 0x15b   :  { %v565_v15 = vmul.f32 0.5, %v564_v14 }
 0x15d   :  { %v566_v16 = vsub.f32 1.5, %v565_v15 }
 0x15f   :  { %v567_v17 = vmul.f32 %v655_v11, %v566_v16 }
 0x161   :  { %v571_v19 = vsel %vm570_vm10, %v655_v11, %v567_v17 }
 0x162   :  { %v573_v20 = vrot.slane %v571_v19, 1 }
 0x164   :  { %v575_v21 = vmul.f32 %v573_v20, %v560_v18 }
 0x166   :  { %v577_v23 = vmul.f32 %v575_v21, %v553_v5  ;;  %v579_v24 = vperm.slane %v575_v21, 0 }
 0x168   :  { %v578_v25 = vsub.f32 %v576_v22, %v577_v23  ;;  %v580_v26 = vmul.f32 %v579_v24, %v255_v39  ;;  %v581_v27 = vmul.f32 %v579_v24, %v256_v38  ;;  %v582_v28 = vmul.f32 %v579_v24, %v257_v40 }
 0x169   :  { %v583_v29 = vmul.f32 %v579_v24, %v258_v50 }
 0x16a   :  { %v584_v31 = vperm.slane %v578_v25, 0 }
 0x16c   :  { %v585_v32 = vadd.f32 %v584_v31, %v580_v26  ;;  %v586_v33 = vadd.f32 %v584_v31, %v581_v27  ;;  %v587_v34 = vadd.f32 %v584_v31, %v582_v28  ;;  %v588_v35 = vadd.f32 %v584_v31, %v583_v29 }
 0x16e   :  { %vm589_vm11 = vcmp.ge.f32.partialorder %v585_v32, 0.0  ;;  %vm590_vm12 = vcmp.ge.f32.partialorder %v586_v33, 0.0  ;;  %vm591_vm13 = vcmp.ge.f32.partialorder %v587_v34, 0.0  ;;  %vm592_vm14 = vcmp.ge.f32.partialorder %v588_v35, 0.0 }
 0x16f   :  { %v593_v30 = vmul.f32 0.01, %v585_v32  ;;  %v594_v36 = vmul.f32 0.01, %v586_v33  ;;  %v595_v37 = vmul.f32 0.01, %v587_v34 }
 0x170   :  { %v596_v41 = vmul.f32 0.01, %v588_v35 }
 0x171   :  { %v597_v13 = vsel %vm589_vm11, %v585_v32, %v593_v30  ;;  %v598_v42 = vsel %vm590_vm12, %v586_v33, %v594_v36  ;;  %v599_v43 = vsel %vm591_vm13, %v587_v34, %v595_v37 }
 0x172   :  { %v600_v39 = vsel %vm592_vm14, %v588_v35, %v596_v41  ;;  %601 = vst [vmem:[%s879_s3] sm:$0xff] %v597_v13 }
 0x173   :  { %602 = vst [vmem:[%s879_s3 + $0x8] sm:$0xff] %v598_v42 }
 0x174   :  { %603 = vst [vmem:[%s879_s3 + $0x10] sm:$0xff] %v599_v43 }
 0x175   :  { %604 = vst [vmem:[%s879_s3 + $0x18] sm:$0xff] %v600_v39 }

</bundles_post_ra>
